<compile_context>
chip_gen: v6e
topology: v6e:2x2x1
jax: 0.10.0
libtpu: 0.0.40
codegen_flags: <defaults>
</compile_context>

<pallas_src>
import functools

import jax
import jax.numpy as jnp
from jax.experimental import pallas as pl
from jax.experimental.pallas import tpu as pltpu


def _round_up(x, m):
    return ((x + m - 1) // m) * m


# ----------------------------------------------------------------------------- #
# Pass 1: packed gate MLP -> cached xh (bf16) + packed per-graph feature sums.
# ----------------------------------------------------------------------------- #
def _gate_scatter_kernel(x_ref, bt_ref, gr_ref, w1_ref, b1_ref, w2_ref, b2_ref,
                         xh_ref, acc_ref):
    t = pl.program_id(0)

    xp_b = x_ref[...]                                   # [TNP, P*D] bf16, P nodes/row

    # SE gate: Tanh(Linear(ReLU(Linear(x)))) with block-diagonal packed weights.
    h = jnp.dot(xp_b, w1_ref[...],
                preferred_element_type=jnp.float32) + b1_ref[...]
    h = jnp.maximum(h, 0.0)
    att = jnp.tanh(
        jnp.dot(h.astype(jnp.bfloat16), w2_ref[...],
                preferred_element_type=jnp.float32) + b2_ref[...])

    xh = (att + 1.0) * xp_b.astype(jnp.float32)         # == att * x + x
    xh_b = xh.astype(jnp.bfloat16)
    xh_ref[...] = xh_b                                  # cache for pass 2 (lane-dense)

    # Packed one-hot scatter: row (g*P + q) selects nodes in lane-slot q with
    # batch == g; padded nodes carry batch == G -> all-zero row.  The diagonal
    # lane-blocks of acc are extracted in the wrapper.
    onehot = (bt_ref[...] == gr_ref[...]).astype(jnp.bfloat16)   # [P*G, TNP]

    @pl.when(t == 0)
    def _init():
        acc_ref[...] = jnp.zeros_like(acc_ref)

    acc_ref[...] += jnp.dot(onehot, xh_b, preferred_element_type=jnp.float32)


# ----------------------------------------------------------------------------- #
# Pass 2: per-node coefficients + weighted scatter-add (packed layout throughout).
# ----------------------------------------------------------------------------- #
def _coef_scatter_kernel(xh_ref, bt_ref, gr_ref, bsel_ref, gl_ref,
                         tgexp_ref, bsum_ref, out_ref):
    t = pl.program_id(0)

    xh_b = xh_ref[...]                                  # [TNP, P*D] bf16
    xh = xh_b.astype(jnp.float32)

    # Gather tg[batch[n], :] into the packed layout: one-hot [TNP, P*G] times the
    # block-expanded tg [P*G, P*D].
    sel = (bsel_ref[...] == gl_ref[...]).astype(jnp.bfloat16)    # [TNP, P*G]
    tg_g = jnp.dot(sel, tgexp_ref[...],
                   preferred_element_type=jnp.float32)           # [TNP, P*D]

    # Per-node <xh, tg>: block-diag all-ones matmul sums each node's D lanes and
    # broadcasts the result back across those lanes (K = 128, MXU-friendly).
    prod = (xh * tg_g).astype(jnp.bfloat16)
    logit = jnp.dot(prod, bsum_ref[...], preferred_element_type=jnp.float32)
    coefs = jax.nn.sigmoid(logit)
    weighted = (coefs * xh).astype(jnp.bfloat16)

    onehot = (bt_ref[...] == gr_ref[...]).astype(jnp.bfloat16)   # [P*G, TNP]

    @pl.when(t == 0)
    def _init():
        out_ref[...] = jnp.zeros_like(out_ref)

    out_ref[...] += jnp.dot(onehot, weighted, preferred_element_type=jnp.float32)


# ----------------------------------------------------------------------------- #
# Wrapper
# ----------------------------------------------------------------------------- #
@functools.partial(jax.jit, static_argnums=(3,),
                   static_argnames=("tile_n", "interpret"))
def attention_module_forward(x, batch, params, num_graphs, *, tile_n=8192,
                             interpret=False):
    """Pallas forward of AttentionModule. x: [N, D] f32, batch: [N] int32."""
    x = jnp.asarray(x, jnp.float32)
    batch = jnp.asarray(batch, jnp.int32).reshape(-1)
    N, D = x.shape
    G = int(num_graphs)

    # Lane packing factor: P nodes per 128-lane row (P=4 for D=32).
    P = 128 // D if (D <= 128 and 128 % D == 0) else 1
    PD, PG = P * D, P * G
    H = params["w1"].shape[1]
    PH = P * H

    # tile_n must keep the packed tile's sublane dim a multiple of 128.
    base = 128 * P
    TN = max(base, min(_round_up(int(tile_n), base), _round_up(N, base)))
    n_pad = _round_up(N, TN)
    n_tiles = n_pad // TN
    TNP = TN // P

    # ---------------- operand prep (cheap, done once in XLA) --------------------
    x_p = jnp.zeros((n_pad, D), jnp.float32).at[:N].set(x)
    x_pack = x_p.reshape(n_pad // P, PD).astype(jnp.bfloat16)    # bf16 HBM stream

    b_p = jnp.full((n_pad,), G, jnp.int32).at[:N].set(batch)     # pad id G -> zero one-hot
    b_mat = b_p.reshape(n_pad // P, P)
    bt = jnp.tile(b_mat.T, (G, 1))      # [P*G, n_pad/P]; row g*P+q holds batch[P*r+q]
    bsel = jnp.tile(b_mat, (1, G))      # [n_pad/P, P*G]; col g*P+q holds batch[P*r+q]
    gr = (jnp.arange(PG, dtype=jnp.int32) // P).reshape(PG, 1)   # graph id per row
    gl = gr.reshape(1, PG)                                       # graph id per lane

    eyeP = jnp.eye(P, dtype=jnp.float32)
    w1 = params["w1"].astype(jnp.float32)
    w2 = params["w2"].astype(jnp.float32)
    w1_bd = jnp.einsum("qp,dh->qdph", eyeP, w1).reshape(PD, PH).astype(jnp.bfloat16)
    w2_bd = jnp.einsum("qp,hd->qhpd", eyeP, w2).reshape(PH, PD).astype(jnp.bfloat16)
    b1_p = jnp.tile(params["b1"].reshape(1, H).astype(jnp.float32), (1, P))
    b2_p = jnp.tile(params["b2"].reshape(1, D).astype(jnp.float32), (1, P))
    bsum = jnp.kron(eyeP, jnp.ones((D, D), jnp.float32)).astype(jnp.bfloat16)

    cparams = pltpu.CompilerParams(dimension_semantics=("arbitrary",),
                                   vmem_limit_bytes=32 * 1024 * 1024)

    # ---------------- pass 1: gate MLP + packed per-graph sums ------------------
    xh_pack, acc_pack = pl.pallas_call(
        _gate_scatter_kernel,
        out_shape=(jax.ShapeDtypeStruct((n_pad // P, PD), jnp.bfloat16),
                   jax.ShapeDtypeStruct((PG, PD), jnp.float32)),
        grid_spec=pltpu.PrefetchScalarGridSpec(
            num_scalar_prefetch=0,
            grid=(n_tiles,),
            in_specs=[
                pl.BlockSpec((TNP, PD), lambda i: (i, 0)),   # packed x tile
                pl.BlockSpec((PG, TNP), lambda i: (0, i)),   # batch, [P*G, TNP] layout
                pl.BlockSpec((PG, 1), lambda i: (0, 0)),     # per-row graph ids
                pl.BlockSpec((PD, PH), lambda i: (0, 0)),    # w1 block-diag
                pl.BlockSpec((1, PH), lambda i: (0, 0)),     # b1 tiled
                pl.BlockSpec((PH, PD), lambda i: (0, 0)),    # w2 block-diag
                pl.BlockSpec((1, PD), lambda i: (0, 0)),     # b2 tiled
            ],
            out_specs=(pl.BlockSpec((TNP, PD), lambda i: (i, 0)),   # cached xh
                       pl.BlockSpec((PG, PD), lambda i: (0, 0))),   # packed sums
        ),
        compiler_params=cparams,
        interpret=interpret,
    )(x_pack, bt, gr, w1_bd, b1_p, w2_bd, b2_p)

    # ------------- tiny per-graph glue in plain JAX (mean, tg) ------------------
    sums = jnp.einsum("gqqd->gd", acc_pack.reshape(G, P, P, D))
    counts = jax.ops.segment_sum(jnp.ones((N,), jnp.float32), batch,
                                 num_segments=G)
    mean = sums / jnp.maximum(counts, 1.0)[:, None]
    tg = jnp.tanh(mean @ params["wm"].astype(jnp.float32))          # [G, D]
    tg_exp = jnp.einsum("gd,qp->gqpd", tg, eyeP).reshape(PG, PD).astype(jnp.bfloat16)

    # ---------------- pass 2: coefficients + weighted scatter -------------------
    out_pack = pl.pallas_call(
        _coef_scatter_kernel,
        out_shape=jax.ShapeDtypeStruct((PG, PD), jnp.float32),
        grid_spec=pltpu.PrefetchScalarGridSpec(
            num_scalar_prefetch=0,
            grid=(n_tiles,),
            in_specs=[
                pl.BlockSpec((TNP, PD), lambda i: (i, 0)),   # cached xh tile
                pl.BlockSpec((PG, TNP), lambda i: (0, i)),   # batch, [P*G, TNP]
                pl.BlockSpec((PG, 1), lambda i: (0, 0)),     # per-row graph ids
                pl.BlockSpec((TNP, PG), lambda i: (i, 0)),   # batch, [TNP, P*G]
                pl.BlockSpec((1, PG), lambda i: (0, 0)),     # per-lane graph ids
                pl.BlockSpec((PG, PD), lambda i: (0, 0)),    # tg block-expanded
                pl.BlockSpec((PD, PD), lambda i: (0, 0)),    # block-sum matrix
            ],
            out_specs=pl.BlockSpec((PG, PD), lambda i: (0, 0)),
        ),
        compiler_params=cparams,
        interpret=interpret,
    )(xh_pack, bt, gr, bsel, gl, tg_exp, bsum)

    return jnp.einsum("gqqd->gd", out_pack.reshape(G, P, P, D))


# ----------------------------------------------------------------------------- #
# Parameters / reference
# ----------------------------------------------------------------------------- #
def init_params(key, dim_size):
    """Parameter init matching the module's shapes (weights stored as [in, out])."""
    hidden = dim_size // 4
    k_wm, k_w1, k_b1, k_w2, k_b2 = jax.random.split(key, 5)

    limit_wm = (6.0 / (dim_size + dim_size)) ** 0.5           # xavier_uniform
    wm = jax.random.uniform(k_wm, (dim_size, dim_size), jnp.float32,
                            -limit_wm, limit_wm)

    lim1 = 1.0 / (dim_size ** 0.5)
    w1 = jax.random.uniform(k_w1, (dim_size, hidden), jnp.float32, -lim1, lim1)
    b1 = jax.random.uniform(k_b1, (1, hidden), jnp.float32, -lim1, lim1)

    lim2 = 1.0 / (hidden ** 0.5)
    w2 = jax.random.uniform(k_w2, (hidden, dim_size), jnp.float32, -lim2, lim2)
    b2 = jax.random.uniform(k_b2, (1, dim_size), jnp.float32, -lim2, lim2)

    return {"wm": wm, "w1": w1, "b1": b1, "w2": w2, "b2": b2}


def reference_forward(x, batch, params, num_graphs):
    """Pure-JAX f32 reference (mirrors the PyTorch forward)."""
    h = jnp.maximum(x @ params["w1"] + params["b1"], 0.0)
    att = jnp.tanh(h @ params["w2"] + params["b2"])
    xh = att * x + x
    onehot = jax.nn.one_hot(batch, num_graphs, dtype=jnp.float32)   # [N, G]
    sums = onehot.T @ xh
    counts = jnp.maximum(onehot.sum(axis=0, keepdims=True).T, 1.0)
    mean = sums / counts
    tg = jnp.tanh(mean @ params["wm"])
    coefs = jax.nn.sigmoid(jnp.sum(xh * tg[batch], axis=1, keepdims=True))
    return onehot.T @ (coefs * xh)


def _rel_err(a, b):
    return float(jnp.max(jnp.abs(a - b)) / jnp.maximum(jnp.max(jnp.abs(b)), 1.0))


if __name__ == "__main__":
    key = jax.random.PRNGKey(0)
    k_x, k_p, k_x2, k_b2 = jax.random.split(key, 4)

    # --- tiny demo matching the module (dim_size=32, 2 graphs of 4 nodes each) ---
    N, D, G = 8, 32, 2
    x = jax.random.normal(k_x, (N, D), jnp.float32)
    batch = jnp.array([0, 0, 0, 0, 1, 1, 1, 1], dtype=jnp.int32)
    params = init_params(k_p, D)

    out = jax.block_until_ready(attention_module_forward(x, batch, params, G))
    ref = reference_forward(x, batch, params, G)
    assert out.shape == (G, D)
    assert _rel_err(out, ref) < 5e-2, f"mismatch vs reference: {_rel_err(out, ref)}"

    # --- multi-tile case exercising the resident accumulators over several tiles --
    N2, G2 = 1500, 3
    x2 = jax.random.normal(k_x2, (N2, D), jnp.float32)
    batch2 = jax.random.randint(k_b2, (N2,), 0, G2, dtype=jnp.int32)
    out2 = jax.block_until_ready(
        attention_module_forward(x2, batch2, params, G2, tile_n=512))
    ref2 = reference_forward(x2, batch2, params, G2)
    assert out2.shape == (G2, D)
    assert _rel_err(out2, ref2) < 5e-2, f"multi-tile mismatch: {_rel_err(out2, ref2)}"

    print("KERNEL_OK")
</pallas_src>

<mosaic_0001>
module attributes {stable_mosaic.version = 11 : i64} {
  func.func private @main(%arg0: i32) attributes {dimension_semantics = [#tpu.dimension_semantics<core_parallel>], iteration_bounds = array<i64: 2>, tpu.core_type = #tpu.core_type<sc_scalar_subcore>, window_params = []} {
    return
  }
}

module attributes {stable_mosaic.version = 11 : i64} {
  func.func private @main(%arg0: i32) attributes {dimension_semantics = [#tpu.dimension_semantics<core_parallel>], iteration_bounds = array<i64: 2>, tpu.core_type = #tpu.core_type<sc_scalar_subcore>, window_params = []} {
    return
  }
}

module attributes {stable_mosaic.version = 11 : i64} {
  func.func @_gate_scatter_kernel(%arg0: i32, %arg1: memref<128x128xbf16, #tpu.memory_space<vmem>>, %arg2: memref<8x128xi32, #tpu.memory_space<vmem>>, %arg3: memref<8x1xi32, #tpu.memory_space<vmem>>, %arg4: memref<128x32xbf16, #tpu.memory_space<vmem>>, %arg5: memref<1x32xf32, #tpu.memory_space<vmem>>, %arg6: memref<32x128xbf16, #tpu.memory_space<vmem>>, %arg7: memref<1x128xf32, #tpu.memory_space<vmem>>, %arg8: memref<128x128xbf16, #tpu.memory_space<vmem>>, %arg9: memref<8x128xf32, #tpu.memory_space<vmem>>) attributes {dimension_semantics = [#tpu.dimension_semantics<arbitrary>], iteration_bounds = array<i64: 1>, scalar_prefetch = 0 : i64, scratch_operands = 0 : i64, tpu.core_type = #tpu.core_type<tc>, window_params = [{transform_indices = @transform_0, window_bounds = array<i64: 128, 128>}, {transform_indices = @transform_1, window_bounds = array<i64: 8, 128>}, {pipeline_mode = #tpu.pipeline_mode<synchronous>, transform_indices = @transform_2, window_bounds = array<i64: 8, 1>}, {pipeline_mode = #tpu.pipeline_mode<synchronous>, transform_indices = @transform_3, window_bounds = array<i64: 128, 32>}, {pipeline_mode = #tpu.pipeline_mode<synchronous>, transform_indices = @transform_4, window_bounds = array<i64: 1, 32>}, {pipeline_mode = #tpu.pipeline_mode<synchronous>, transform_indices = @transform_5, window_bounds = array<i64: 32, 128>}, {pipeline_mode = #tpu.pipeline_mode<synchronous>, transform_indices = @transform_6, window_bounds = array<i64: 1, 128>}, {transform_indices = @transform_7, window_bounds = array<i64: 128, 128>}, {pipeline_mode = #tpu.pipeline_mode<synchronous>, transform_indices = @transform_8, window_bounds = array<i64: 8, 128>}]} {
    %c0 = arith.constant 0 : index
    %c0_0 = arith.constant 0 : index
    %0 = vector.load %arg1[%c0, %c0_0] : memref<128x128xbf16, #tpu.memory_space<vmem>>, vector<128x128xbf16>
    %c0_1 = arith.constant 0 : index
    %c0_2 = arith.constant 0 : index
    %1 = vector.load %arg4[%c0_1, %c0_2] : memref<128x32xbf16, #tpu.memory_space<vmem>>, vector<128x32xbf16>
    %cst = arith.constant dense<0.000000e+00> : vector<128x32xf32>
    %2 = tpu.matmul %0, %1, %cst {dimension_numbers = #tpu.dot_dimension_numbers<[1], [0], [0], [1], [0, 0, 1, 1], [], []>} : vector<128x128xbf16>, vector<128x32xbf16>, vector<128x32xf32> -> vector<128x32xf32>
    %c0_3 = arith.constant 0 : index
    %c0_4 = arith.constant 0 : index
    %3 = vector.load %arg5[%c0_3, %c0_4] : memref<1x32xf32, #tpu.memory_space<vmem>>, vector<1x32xf32>
    %4 = vector.broadcast %3 : vector<1x32xf32> to vector<128x32xf32>
    %5 = arith.addf %2, %4 : vector<128x32xf32>
    %cst_5 = arith.constant 0.000000e+00 : f32
    %6 = vector.broadcast %cst_5 : f32 to vector<128x32xf32>
    %7 = arith.maximumf %5, %6 : vector<128x32xf32>
    %8 = arith.truncf %7 : vector<128x32xf32> to vector<128x32xbf16>
    %c0_6 = arith.constant 0 : index
    %c0_7 = arith.constant 0 : index
    %9 = vector.load %arg6[%c0_6, %c0_7] : memref<32x128xbf16, #tpu.memory_space<vmem>>, vector<32x128xbf16>
    %cst_8 = arith.constant dense<0.000000e+00> : vector<128x128xf32>
    %10 = tpu.matmul %8, %9, %cst_8 {dimension_numbers = #tpu.dot_dimension_numbers<[1], [0], [0], [1], [0, 0, 1, 1], [], []>} : vector<128x32xbf16>, vector<32x128xbf16>, vector<128x128xf32> -> vector<128x128xf32>
    %c0_9 = arith.constant 0 : index
    %c0_10 = arith.constant 0 : index
    %11 = vector.load %arg7[%c0_9, %c0_10] : memref<1x128xf32, #tpu.memory_space<vmem>>, vector<1x128xf32>
    %12 = vector.broadcast %11 : vector<1x128xf32> to vector<128x128xf32>
    %13 = arith.addf %10, %12 : vector<128x128xf32>
    %14 = math.tanh %13 : vector<128x128xf32>
    %cst_11 = arith.constant 1.000000e+00 : f32
    %15 = vector.broadcast %cst_11 : f32 to vector<128x128xf32>
    %16 = arith.addf %14, %15 : vector<128x128xf32>
    %17 = arith.extf %0 : vector<128x128xbf16> to vector<128x128xf32>
    %18 = arith.mulf %16, %17 : vector<128x128xf32>
    %19 = arith.truncf %18 : vector<128x128xf32> to vector<128x128xbf16>
    %c0_12 = arith.constant 0 : index
    %c0_13 = arith.constant 0 : index
    %20 = vector.load %arg8[%c0_12, %c0_13] : memref<128x128xbf16, #tpu.memory_space<vmem>>, vector<128x128xbf16>
    tpu.vector_store %arg8[%c0_12, %c0_13], %19 {strides = array<i32>} : memref<128x128xbf16, #tpu.memory_space<vmem>>, vector<128x128xbf16>,
    %c0_14 = arith.constant 0 : index
    %c0_15 = arith.constant 0 : index
    %21 = vector.load %arg2[%c0_14, %c0_15] : memref<8x128xi32, #tpu.memory_space<vmem>>, vector<8x128xi32>
    %c0_16 = arith.constant 0 : index
    %c0_17 = arith.constant 0 : index
    %22 = vector.load %arg3[%c0_16, %c0_17] : memref<8x1xi32, #tpu.memory_space<vmem>>, vector<8x1xi32>
    %23 = vector.broadcast %22 : vector<8x1xi32> to vector<8x128xi32>
    %24 = arith.cmpi eq, %21, %23 : vector<8x128xi32>
    %25 = arith.extui %24 : vector<8x128xi1> to vector<8x128xi32>
    %26 = arith.sitofp %25 : vector<8x128xi32> to vector<8x128xf32>
    %27 = arith.truncf %26 : vector<8x128xf32> to vector<8x128xbf16>
    %c0_i32 = arith.constant 0 : i32
    %28 = arith.cmpi eq, %arg0, %c0_i32 : i32
    %29 = arith.extui %28 : i1 to i32
    %c0_i32_18 = arith.constant 0 : i32
    %30 = arith.cmpi ne, %29, %c0_i32_18 : i32
    scf.if %30 {
      %cst_24 = arith.constant 0.000000e+00 : f32
      %35 = vector.broadcast %cst_24 : f32 to vector<8x128xf32>
      %c0_25 = arith.constant 0 : index
      %c0_26 = arith.constant 0 : index
      %36 = vector.load %arg9[%c0_25, %c0_26] : memref<8x128xf32, #tpu.memory_space<vmem>>, vector<8x128xf32>
      tpu.vector_store %arg9[%c0_25, %c0_26], %35 {strides = array<i32>} : memref<8x128xf32, #tpu.memory_space<vmem>>, vector<8x128xf32>,
    } else {
    }
    %c0_19 = arith.constant 0 : index
    %c0_20 = arith.constant 0 : index
    %31 = vector.load %arg9[%c0_19, %c0_20] : memref<8x128xf32, #tpu.memory_space<vmem>>, vector<8x128xf32>
    %cst_21 = arith.constant dense<0.000000e+00> : vector<8x128xf32>
    %32 = tpu.matmul %27, %19, %cst_21 {dimension_numbers = #tpu.dot_dimension_numbers<[1], [0], [0], [1], [0, 0, 1, 1], [], []>} : vector<8x128xbf16>, vector<128x128xbf16>, vector<8x128xf32> -> vector<8x128xf32>
    %33 = arith.addf %31, %32 : vector<8x128xf32>
    %c0_22 = arith.constant 0 : index
    %c0_23 = arith.constant 0 : index
    %34 = vector.load %arg9[%c0_22, %c0_23] : memref<8x128xf32, #tpu.memory_space<vmem>>, vector<8x128xf32>
    tpu.vector_store %arg9[%c0_22, %c0_23], %33 {strides = array<i32>} : memref<8x128xf32, #tpu.memory_space<vmem>>, vector<8x128xf32>,
    return
  }
  func.func @transform_0(%arg0: i32) -> (i32, i32) {
    %c0_i32 = arith.constant 0 : i32
    %c0_i32_0 = arith.constant 0 : i32
    return %arg0, %c0_i32 : i32, i32
  }
  func.func @transform_1(%arg0: i32) -> (i32, i32) {
    %c0_i32 = arith.constant 0 : i32
    %c0_i32_0 = arith.constant 0 : i32
    return %c0_i32, %arg0 : i32, i32
  }
  func.func @transform_2(%arg0: i32) -> (i32, i32) {
    %c0_i32 = arith.constant 0 : i32
    %c0_i32_0 = arith.constant 0 : i32
    %c0_i32_1 = arith.constant 0 : i32
    return %c0_i32, %c0_i32_0 : i32, i32
  }
  func.func @transform_3(%arg0: i32) -> (i32, i32) {
    %c0_i32 = arith.constant 0 : i32
    %c0_i32_0 = arith.constant 0 : i32
    %c0_i32_1 = arith.constant 0 : i32
    return %c0_i32, %c0_i32_0 : i32, i32
  }
  func.func @transform_4(%arg0: i32) -> (i32, i32) {
    %c0_i32 = arith.constant 0 : i32
    %c0_i32_0 = arith.constant 0 : i32
    %c0_i32_1 = arith.constant 0 : i32
    return %c0_i32, %c0_i32_0 : i32, i32
  }
  func.func @transform_5(%arg0: i32) -> (i32, i32) {
    %c0_i32 = arith.constant 0 : i32
    %c0_i32_0 = arith.constant 0 : i32
    %c0_i32_1 = arith.constant 0 : i32
    return %c0_i32, %c0_i32_0 : i32, i32
  }
  func.func @transform_6(%arg0: i32) -> (i32, i32) {
    %c0_i32 = arith.constant 0 : i32
    %c0_i32_0 = arith.constant 0 : i32
    %c0_i32_1 = arith.constant 0 : i32
    return %c0_i32, %c0_i32_0 : i32, i32
  }
  func.func @transform_7(%arg0: i32) -> (i32, i32) {
    %c0_i32 = arith.constant 0 : i32
    %c0_i32_0 = arith.constant 0 : i32
    return %arg0, %c0_i32 : i32, i32
  }
  func.func @transform_8(%arg0: i32) -> (i32, i32) {
    %c0_i32 = arith.constant 0 : i32
    %c0_i32_0 = arith.constant 0 : i32
    %c0_i32_1 = arith.constant 0 : i32
    return %c0_i32, %c0_i32_0 : i32, i32
  }
}

module attributes {stable_mosaic.version = 11 : i64} {
  func.func @_coef_scatter_kernel(%arg0: i32, %arg1: memref<128x128xbf16, #tpu.memory_space<vmem>>, %arg2: memref<8x128xi32, #tpu.memory_space<vmem>>, %arg3: memref<8x1xi32, #tpu.memory_space<vmem>>, %arg4: memref<128x8xi32, #tpu.memory_space<vmem>>, %arg5: memref<1x8xi32, #tpu.memory_space<vmem>>, %arg6: memref<8x128xbf16, #tpu.memory_space<vmem>>, %arg7: memref<128x128xbf16, #tpu.memory_space<vmem>>, %arg8: memref<8x128xf32, #tpu.memory_space<vmem>>) attributes {dimension_semantics = [#tpu.dimension_semantics<arbitrary>], iteration_bounds = array<i64: 1>, scalar_prefetch = 0 : i64, scratch_operands = 0 : i64, tpu.core_type = #tpu.core_type<tc>, window_params = [{transform_indices = @transform_0, window_bounds = array<i64: 128, 128>}, {transform_indices = @transform_1, window_bounds = array<i64: 8, 128>}, {pipeline_mode = #tpu.pipeline_mode<synchronous>, transform_indices = @transform_2, window_bounds = array<i64: 8, 1>}, {transform_indices = @transform_3, window_bounds = array<i64: 128, 8>}, {pipeline_mode = #tpu.pipeline_mode<synchronous>, transform_indices = @transform_4, window_bounds = array<i64: 1, 8>}, {pipeline_mode = #tpu.pipeline_mode<synchronous>, transform_indices = @transform_5, window_bounds = array<i64: 8, 128>}, {pipeline_mode = #tpu.pipeline_mode<synchronous>, transform_indices = @transform_6, window_bounds = array<i64: 128, 128>}, {pipeline_mode = #tpu.pipeline_mode<synchronous>, transform_indices = @transform_7, window_bounds = array<i64: 8, 128>}]} {
    %c0 = arith.constant 0 : index
    %c0_0 = arith.constant 0 : index
    %0 = vector.load %arg1[%c0, %c0_0] : memref<128x128xbf16, #tpu.memory_space<vmem>>, vector<128x128xbf16>
    %1 = arith.extf %0 : vector<128x128xbf16> to vector<128x128xf32>
    %c0_1 = arith.constant 0 : index
    %c0_2 = arith.constant 0 : index
    %2 = vector.load %arg4[%c0_1, %c0_2] : memref<128x8xi32, #tpu.memory_space<vmem>>, vector<128x8xi32>
    %c0_3 = arith.constant 0 : index
    %c0_4 = arith.constant 0 : index
    %3 = vector.load %arg5[%c0_3, %c0_4] : memref<1x8xi32, #tpu.memory_space<vmem>>, vector<1x8xi32>
    %4 = vector.broadcast %3 : vector<1x8xi32> to vector<128x8xi32>
    %5 = arith.cmpi eq, %2, %4 : vector<128x8xi32>
    %6 = arith.extui %5 : vector<128x8xi1> to vector<128x8xi32>
    %7 = arith.sitofp %6 : vector<128x8xi32> to vector<128x8xf32>
    %8 = arith.truncf %7 : vector<128x8xf32> to vector<128x8xbf16>
    %c0_5 = arith.constant 0 : index
    %c0_6 = arith.constant 0 : index
    %9 = vector.load %arg6[%c0_5, %c0_6] : memref<8x128xbf16, #tpu.memory_space<vmem>>, vector<8x128xbf16>
    %cst = arith.constant dense<0.000000e+00> : vector<128x128xf32>
    %10 = tpu.matmul %8, %9, %cst {dimension_numbers = #tpu.dot_dimension_numbers<[1], [0], [0], [1], [0, 0, 1, 1], [], []>} : vector<128x8xbf16>, vector<8x128xbf16>, vector<128x128xf32> -> vector<128x128xf32>
    %11 = arith.mulf %1, %10 : vector<128x128xf32>
    %12 = arith.truncf %11 : vector<128x128xf32> to vector<128x128xbf16>
    %c0_7 = arith.constant 0 : index
    %c0_8 = arith.constant 0 : index
    %13 = vector.load %arg7[%c0_7, %c0_8] : memref<128x128xbf16, #tpu.memory_space<vmem>>, vector<128x128xbf16>
    %cst_9 = arith.constant dense<0.000000e+00> : vector<128x128xf32>
    %14 = tpu.matmul %12, %13, %cst_9 {dimension_numbers = #tpu.dot_dimension_numbers<[1], [0], [0], [1], [0, 0, 1, 1], [], []>} : vector<128x128xbf16>, vector<128x128xbf16>, vector<128x128xf32> -> vector<128x128xf32>
    %15 = arith.negf %14 : vector<128x128xf32>
    %16 = math.exp %15 : vector<128x128xf32>
    %cst_10 = arith.constant 1.000000e+00 : f32
    %17 = vector.broadcast %cst_10 : f32 to vector<128x128xf32>
    %18 = arith.addf %17, %16 : vector<128x128xf32>
    %19 = arith.divf %17, %18 : vector<128x128xf32>
    %20 = arith.mulf %19, %1 : vector<128x128xf32>
    %21 = arith.truncf %20 : vector<128x128xf32> to vector<128x128xbf16>
    %c0_11 = arith.constant 0 : index
    %c0_12 = arith.constant 0 : index
    %22 = vector.load %arg2[%c0_11, %c0_12] : memref<8x128xi32, #tpu.memory_space<vmem>>, vector<8x128xi32>
    %c0_13 = arith.constant 0 : index
    %c0_14 = arith.constant 0 : index
    %23 = vector.load %arg3[%c0_13, %c0_14] : memref<8x1xi32, #tpu.memory_space<vmem>>, vector<8x1xi32>
    %24 = vector.broadcast %23 : vector<8x1xi32> to vector<8x128xi32>
    %25 = arith.cmpi eq, %22, %24 : vector<8x128xi32>
    %26 = arith.extui %25 : vector<8x128xi1> to vector<8x128xi32>
    %27 = arith.sitofp %26 : vector<8x128xi32> to vector<8x128xf32>
    %28 = arith.truncf %27 : vector<8x128xf32> to vector<8x128xbf16>
    %c0_i32 = arith.constant 0 : i32
    %29 = arith.cmpi eq, %arg0, %c0_i32 : i32
    %30 = arith.extui %29 : i1 to i32
    %c0_i32_15 = arith.constant 0 : i32
    %31 = arith.cmpi ne, %30, %c0_i32_15 : i32
    scf.if %31 {
      %cst_21 = arith.constant 0.000000e+00 : f32
      %36 = vector.broadcast %cst_21 : f32 to vector<8x128xf32>
      %c0_22 = arith.constant 0 : index
      %c0_23 = arith.constant 0 : index
      %37 = vector.load %arg8[%c0_22, %c0_23] : memref<8x128xf32, #tpu.memory_space<vmem>>, vector<8x128xf32>
      tpu.vector_store %arg8[%c0_22, %c0_23], %36 {strides = array<i32>} : memref<8x128xf32, #tpu.memory_space<vmem>>, vector<8x128xf32>,
    } else {
    }
    %c0_16 = arith.constant 0 : index
    %c0_17 = arith.constant 0 : index
    %32 = vector.load %arg8[%c0_16, %c0_17] : memref<8x128xf32, #tpu.memory_space<vmem>>, vector<8x128xf32>
    %cst_18 = arith.constant dense<0.000000e+00> : vector<8x128xf32>
    %33 = tpu.matmul %28, %21, %cst_18 {dimension_numbers = #tpu.dot_dimension_numbers<[1], [0], [0], [1], [0, 0, 1, 1], [], []>} : vector<8x128xbf16>, vector<128x128xbf16>, vector<8x128xf32> -> vector<8x128xf32>
    %34 = arith.addf %32, %33 : vector<8x128xf32>
    %c0_19 = arith.constant 0 : index
    %c0_20 = arith.constant 0 : index
    %35 = vector.load %arg8[%c0_19, %c0_20] : memref<8x128xf32, #tpu.memory_space<vmem>>, vector<8x128xf32>
    tpu.vector_store %arg8[%c0_19, %c0_20], %34 {strides = array<i32>} : memref<8x128xf32, #tpu.memory_space<vmem>>, vector<8x128xf32>,
    return
  }
  func.func @transform_0(%arg0: i32) -> (i32, i32) {
    %c0_i32 = arith.constant 0 : i32
    %c0_i32_0 = arith.constant 0 : i32
    return %arg0, %c0_i32 : i32, i32
  }
  func.func @transform_1(%arg0: i32) -> (i32, i32) {
    %c0_i32 = arith.constant 0 : i32
    %c0_i32_0 = arith.constant 0 : i32
    return %c0_i32, %arg0 : i32, i32
  }
  func.func @transform_2(%arg0: i32) -> (i32, i32) {
    %c0_i32 = arith.constant 0 : i32
    %c0_i32_0 = arith.constant 0 : i32
    %c0_i32_1 = arith.constant 0 : i32
    return %c0_i32, %c0_i32_0 : i32, i32
  }
  func.func @transform_3(%arg0: i32) -> (i32, i32) {
    %c0_i32 = arith.constant 0 : i32
    %c0_i32_0 = arith.constant 0 : i32
    return %arg0, %c0_i32 : i32, i32
  }
  func.func @transform_4(%arg0: i32) -> (i32, i32) {
    %c0_i32 = arith.constant 0 : i32
    %c0_i32_0 = arith.constant 0 : i32
    %c0_i32_1 = arith.constant 0 : i32
    return %c0_i32, %c0_i32_0 : i32, i32
  }
  func.func @transform_5(%arg0: i32) -> (i32, i32) {
    %c0_i32 = arith.constant 0 : i32
    %c0_i32_0 = arith.constant 0 : i32
    %c0_i32_1 = arith.constant 0 : i32
    return %c0_i32, %c0_i32_0 : i32, i32
  }
  func.func @transform_6(%arg0: i32) -> (i32, i32) {
    %c0_i32 = arith.constant 0 : i32
    %c0_i32_0 = arith.constant 0 : i32
    %c0_i32_1 = arith.constant 0 : i32
    return %c0_i32, %c0_i32_0 : i32, i32
  }
  func.func @transform_7(%arg0: i32) -> (i32, i32) {
    %c0_i32 = arith.constant 0 : i32
    %c0_i32_0 = arith.constant 0 : i32
    %c0_i32_1 = arith.constant 0 : i32
    return %c0_i32, %c0_i32_0 : i32, i32
  }
}

</mosaic_0001>

<bundles_post_ra>
// kernel: attention_module_forward.2
= control target key start
LH: loop header
LB: loop body
LE: loop exit
PB: predicated region body
PF: predicated region fallthrough
CT: control target
= control target key end

     0   :  { %v919_v18 = vmov 0   ;;  %vm308_vm0 = vcmask 261120   ;;  %vm921_vm1 = vmmov 0   ;;  %s1144_s3 = inlined_call_operand.vmem [shape: bf16[128,32], index: 3, kind: input, shape index: {}]   ;;  %s1145_s0 = inlined_call_operand.vmem [shape: bf16[128,128], index: 0, kind: input, shape index: {}]   ;;  %s1146_s5 = inlined_call_operand.vmem [shape: bf16[32,128], index: 5, kind: input, shape index: {}]   ;;  %s1147_s2 = inlined_call_operand.vmem [shape: s32[8,1], index: 2, kind: input, shape index: {}]   ;;  %s1148_s4 = inlined_call_operand.vmem [shape: f32[1,32], index: 4, kind: input, shape index: {}]   ;;  %s1149_s6 = inlined_call_operand.vmem [shape: f32[1,128], index: 6, kind: input, shape index: {}]   ;;  %s1150_s7 = inlined_call_operand.vmem [shape: bf16[128,128], index: 7, kind: output, shape index: {0}]   ;;  %s1151_s1 = inlined_call_operand.vmem [shape: s32[8,128], index: 1, kind: input, shape index: {}]   ;;  %s1152_s8 = inlined_call_operand.vmem [shape: f32[8,128], index: 8, kind: output, shape index: {1}]  }
   0x1   :  { %v861_v0 = vld [vmem:[%s1144_s3 + $0x38] sm:$0xff]   ;;  %v862_v1 = vld [vmem:[%s1144_s3 + $0x30] sm:$0xff]   ;;  %v863_v2 = vld [vmem:[%s1144_s3 + $0x28] sm:$0xff]   ;;  %860 = vset.pattern.permute.xlu0 %v919_v18 }
   0x2   :  { %784 = vmatprep.subr.bf16.mxu0 %v861_v0  ;;  %v864_v3 = vld [vmem:[%s1144_s3 + $0x20] sm:$0xff]   ;;  %v865_v5 = vld [vmem:[%s1144_s3 + $0x18] sm:$0xff]   ;;  %v866_v6 = vld [vmem:[%s1144_s3 + $0x10] sm:$0xff]  }
   0x3   :  { %785 = vmatpush3.bf16.msra.mxu0 %v861_v0  ;;  %v983_v4 = vld [vmem:[%s1145_s0] sm:$0xff]   ;;  %v867_v7 = vld [vmem:[%s1144_s3 + $0x8] sm:$0xff]   ;;  %v1006_v10 = vld [vmem:[%s1145_s0 + $0x10] sm:$0xff]  }
   0x4   :  { %786 = vmatprep.subr.bf16.mxu0 %v862_v1  ;;  %800 = vmatprep.mubr.bf16.mxu0 %v983_v4  ;;  %v868_v8 = vld [vmem:[%s1144_s3] sm:$0xff]   ;;  %v1001_v9 = vld [vmem:[%s1145_s0 + $0x8] sm:$0xff]   ;;  %v1013_v11 = vld [vmem:[%s1145_s0 + $0x18] sm:$0xff]  }
   0x5   :  { %v1018_v12 = vld [vmem:[%s1145_s0 + $0x20] sm:$0xff]   ;;  %v1025_v13 = vld [vmem:[%s1145_s0 + $0x28] sm:$0xff]   ;;  %v1030_v14 = vld [vmem:[%s1145_s0 + $0x30] sm:$0xff]  }
   0x6   :  { %v1037_v15 = vld [vmem:[%s1145_s0 + $0x38] sm:$0xff]   ;;  %v877_v16 = vld [vmem:[%s1146_s5 + $0x8] sm:$0xff]   ;;  %v878_v17 = vld [vmem:[%s1146_s5] sm:$0xff]  }
   0x7   :  { %787 = vmatpush3.bf16.msra.mxu0 %v862_v1  ;;  %816 = vmatprep.subr.bf16.mxu1 %v877_v16  ;;  %v575_v19 = vld [vmem:[%s1147_s2] sm:$0xff] }
   0x8   :  { %788 = vmatprep.subr.bf16.mxu0 %v863_v2  ;;  %817 = vmatpush3.bf16.msra.mxu1 %v877_v16  ;;  %v639_v22 = vld [vmem:[%s1148_s4] ss:$0 sm:$0xff] }
   0x9   :  { %818 = vmatprep.subr.bf16.mxu1 %v878_v17  ;;  %577 = vperm.xlu0 %860, %v575_v19  }
   0xb   :  { %789 = vmatpush3.bf16.msra.mxu0 %v863_v2 }
   0xc   :  { %790 = vmatprep.subr.bf16.mxu0 %v864_v3  ;;  %819 = vmatpush3.bf16.msra.mxu1 %v878_v17 }
   0xf   :  { %791 = vmatpush3.bf16.msra.mxu0 %v864_v3 }
  0x10   :  { %792 = vmatprep.subr.bf16.mxu0 %v865_v5 }
  0x13   :  { %793 = vmatpush3.bf16.msra.mxu0 %v865_v5 }
  0x14   :  { %794 = vmatprep.subr.bf16.mxu0 %v866_v6 }
  0x17   :  { %795 = vmatpush3.bf16.msra.mxu0 %v866_v6 }
  0x18   :  { %796 = vmatprep.subr.bf16.mxu0 %v867_v7 }
  0x1b   :  { %797 = vmatpush3.bf16.msra.mxu0 %v867_v7 }
  0x1c   :  { %798 = vmatprep.subr.bf16.mxu0 %v868_v8 }
  0x1f   :  { %799 = vmatpush3.bf16.msra.mxu0 %v868_v8 }
  0x22   :  { %801 = vmatmul.mubr.bf16.vlgmr.msra.gmra.mxu0 %v1001_v9 }
  0x23   :  { %804 = vmatprep.mubr.bf16.mxu0 %v1006_v10 }
  0x2a   :  { %805 = vmatmul.mubr.bf16.gmra.mxu0 %v1013_v11 }
  0x2b   :  { %808 = vmatprep.mubr.bf16.mxu0 %v1018_v12 }
  0x32   :  { %809 = vmatmul.mubr.bf16.gmra.mxu0 %v1025_v13 }
  0x33   :  { %812 = vmatprep.mubr.bf16.mxu0 %v1030_v14 }
  0x3a   :  { %813 = vmatmul.mubr.bf16.gmra.mxu0 %v1037_v15 }
  0xe2   :  { %v802_v20 = vpop.f32.mrf.mxu0 }
  0xe3   :  { %v207_v26 = vadd.f32 %v802_v20, %v639_v22 }
  0xe4   :  { %v198_v21 = vpop.f32.mrf.mxu0 }
  0xe5   :  { %v199_v24 = vadd.f32 %v639_v22, %v198_v21  ;;  %v263_v33 = vmax.f32 %v207_v26, 0.0  ;;  %v920_v21 = vmov 0.0  }
  0xe6   :  { %v803_v23 = vpop.f32.mrf.mxu0  ;;  %836 = vmatprep.subr.bf16.mxu1 %v920_v21 }
  0xe7   :  { %v210_v25 = vadd.f32 %v803_v23, %v639_v22  ;;  %v261_v31 = vmax.f32 %v199_v24, 0.0 }
  0xe8   :  { %v201_v27 = vpop.f32.mrf.mxu0 }
  0xe9   :  { %v202_v28 = vadd.f32 %v639_v22, %v201_v27  ;;  %v264_v29 = vmax.f32 %v210_v25, 0.0 }
  0xea   :  { %v806_v30 = vpop.f32.mrf.mxu0 }
  0xeb   :  { %v262_v32 = vmax.f32 %v202_v28, 0.0  ;;  %v278_v36 = vpack.c.bf16 %v264_v29, %v263_v33  ;;  %v223_v40 = vadd.f32 %v806_v30, %v639_v22 }
  0xec   :  { %v214_v34 = vpop.f32.mrf.mxu0 }
  0xed   :  { %v277_v35 = vpack.c.bf16 %v262_v32, %v261_v31  ;;  %v215_v38 = vadd.f32 %v639_v22, %v214_v34  ;;  %v267_v47 = vmax.f32 %v223_v40, 0.0 }
  0xee   :  { %v807_v37 = vpop.f32.mrf.mxu0 }
  0xef   :  { %v226_v39 = vadd.f32 %v807_v37, %v639_v22  ;;  %820 = vmatprep.mubr.msk.bf16.mxu1 %vm308_vm0, %v277_v35  ;;  %v265_v45 = vmax.f32 %v215_v38, 0.0 }
  0xf0   :  { %v217_v41 = vpop.f32.mrf.mxu0  ;;  %821 = vmatmul.mubr.msk.bf16.vlgmr.msra.gmra.mxu1 %vm308_vm0, %v278_v36 }
  0xf1   :  { %v218_v42 = vadd.f32 %v639_v22, %v217_v41  ;;  %v268_v43 = vmax.f32 %v226_v39, 0.0 }
  0xf2   :  { %v810_v44 = vpop.f32.mrf.mxu0 }
  0xf3   :  { %v266_v46 = vmax.f32 %v218_v42, 0.0  ;;  %v280_v50 = vpack.c.bf16 %v268_v43, %v267_v47  ;;  %v239_v54 = vadd.f32 %v810_v44, %v639_v22  ;;  %v465_v44 = vunpack.c.h.bf16 %v1001_v9 }
  0xf4   :  { %v230_v48 = vpop.f32.mrf.mxu0  ;;  %v464_v47 = vunpack.c.l.bf16 %v1001_v9 }
  0xf5   :  { %v279_v49 = vpack.c.bf16 %v266_v46, %v265_v45  ;;  %v231_v52 = vadd.f32 %v639_v22, %v230_v48  ;;  %v271_v61 = vmax.f32 %v239_v54, 0.0  ;;  %v462_v54 = vunpack.c.l.bf16 %v983_v4 }
  0xf6   :  { %v811_v51 = vpop.f32.mrf.mxu0 }
  0xf7   :  { %v242_v53 = vadd.f32 %v811_v51, %v639_v22  ;;  %824 = vmatprep.mubr.msk.bf16.mxu1 %vm308_vm0, %v279_v49  ;;  %v269_v59 = vmax.f32 %v231_v52, 0.0 }
  0xf8   :  { %v233_v55 = vpop.f32.mrf.mxu0  ;;  %825 = vmatmul.mubr.msk.bf16.gmra.mxu1 %vm308_vm0, %v280_v50  ;;  %v463_v50 = vunpack.c.h.bf16 %v983_v4 }
  0xf9   :  { %v234_v56 = vadd.f32 %v639_v22, %v233_v55  ;;  %v272_v57 = vmax.f32 %v242_v53, 0.0 }
  0xfa   :  { %v814_v58 = vpop.f32.mrf.mxu0 }
  0xfb   :  { %v270_v60 = vmax.f32 %v234_v56, 0.0  ;;  %v282_v0 = vpack.c.bf16 %v272_v57, %v271_v61  ;;  %v255_v5 = vadd.f32 %v814_v58, %v639_v22 }
  0xfc   :  { %v246_v62 = vpop.f32.mrf.mxu0 }
  0xfd   :  { %v281_v63 = vpack.c.bf16 %v270_v60, %v269_v59  ;;  %v247_v2 = vadd.f32 %v639_v22, %v246_v62  ;;  %v275_v18 = vmax.f32 %v255_v5, 0.0 }
  0xfe   :  { %v815_v1 = vpop.f32.mrf.mxu0 }
  0xff   :  { %v258_v3 = vadd.f32 %v815_v1, %v639_v22  ;;  %828 = vmatprep.mubr.msk.bf16.mxu1 %vm308_vm0, %v281_v63  ;;  %v273_v16 = vmax.f32 %v247_v2, 0.0  ;;  %v468_v1 = vunpack.c.l.bf16 %v1013_v11 }
 0x100   :  { %v249_v6 = vpop.f32.mrf.mxu0  ;;  %829 = vmatmul.mubr.msk.bf16.gmra.mxu1 %vm308_vm0, %v282_v0 }
 0x101   :  { %v250_v7 = vadd.f32 %v639_v22, %v249_v6  ;;  %v276_v8 = vmax.f32 %v258_v3, 0.0  ;;  %v1065_v22 = vld [vmem:[%s1149_s6] ss:$0 sm:$0xff]  ;;  %v469_v6 = vunpack.c.h.bf16 %v1013_v11 }
 0x103   :  { %v274_v17 = vmax.f32 %v250_v7, 0.0  ;;  %v284_v20 = vpack.c.bf16 %v276_v8, %v275_v18 }
 0x105   :  { %v283_v19 = vpack.c.bf16 %v274_v17, %v273_v16  ;;  %v466_v16 = vunpack.c.l.bf16 %v1006_v10  ;;  %v467_v17 = vunpack.c.h.bf16 %v1006_v10 }
 0x107   :  { %832 = vmatprep.mubr.msk.bf16.mxu1 %vm308_vm0, %v283_v19 }
 0x108   :  { %833 = vmatmul.mubr.msk.bf16.gmra.mxu1 %vm308_vm0, %v284_v20 }
 0x109   :  { %852 = vmatprep.mubr.msk.bf16.mxu1 %vm921_vm1, %v920_v21 }
 0x1b0   :  { %v822_v23 = vpop.f32.mrf.mxu1 }
 0x1b1   :  { %v376_v24 = vadd.f32 %v822_v23, %v1065_v22 }
 0x1b2   :  { %v367_v25 = vpop.f32.mrf.mxu1 }
 0x1b3   :  { %v368_v26 = vadd.f32 %v1065_v22, %v367_v25  ;;  %887 = vtanh.f32 %v376_v24 }
 0x1b4   :  { %v823_v27 = vpop.f32.mrf.mxu1 }
 0x1b5   :  { %v379_v28 = vadd.f32 %v823_v27, %v1065_v22  ;;  %889 = vtanh.f32 %v368_v26 }
 0x1b6   :  { %v370_v29 = vpop.f32.mrf.mxu1 }
 0x1b7   :  { %891 = vtanh.f32 %v379_v28  ;;  %v371_v30 = vadd.f32 %v1065_v22, %v370_v29 }
 0x1b8   :  { %v826_v31 = vpop.f32.mrf.mxu1 }
 0x1b9   :  { %893 = vtanh.f32 %v371_v30  ;;  %v392_v32 = vadd.f32 %v826_v31, %v1065_v22 }
 0x1ba   :  { %v383_v33 = vpop.f32.mrf.mxu1 }
 0x1bb   :  { %895 = vtanh.f32 %v392_v32  ;;  %v384_v34 = vadd.f32 %v1065_v22, %v383_v33 }
 0x1bc   :  { %v827_v35 = vpop.f32.mrf.mxu1 }
 0x1bd   :  { %897 = vtanh.f32 %v384_v34  ;;  %v395_v36 = vadd.f32 %v827_v35, %v1065_v22  ;;  %v472_v34 = vunpack.c.l.bf16 %v1025_v13  ;;  %v473_v35 = vunpack.c.h.bf16 %v1025_v13 }
 0x1be   :  { %v386_v37 = vpop.f32.mrf.mxu1 }
 0x1bf   :  { %899 = vtanh.f32 %v395_v36  ;;  %v387_v38 = vadd.f32 %v1065_v22, %v386_v37 }
 0x1c0   :  { %v830_v39 = vpop.f32.mrf.mxu1  ;;  %v888_v40 = vpop.eup %887 }
 0x1c1   :  { %901 = vtanh.f32 %v387_v38  ;;  %v408_v41 = vadd.f32 %v830_v39, %v1065_v22  ;;  %v448_v48 = vadd.f32 1.0, %v888_v40  ;;  %v470_v39 = vunpack.c.l.bf16 %v1018_v12 }
 0x1c2   :  { %v399_v42 = vpop.f32.mrf.mxu1  ;;  %v890_v43 = vpop.eup %889 }
 0x1c3   :  { %903 = vtanh.f32 %v408_v41  ;;  %v400_v45 = vadd.f32 %v1065_v22, %v399_v42  ;;  %v446_v55 = vadd.f32 1.0, %v890_v43  ;;  %v480_v9 = vmul.f32 %v464_v47, %v448_v48 }
 0x1c4   :  { %v892_v46 = vpop.eup %891  ;;  %v831_v49 = vpop.f32.mrf.mxu1 }
 0x1c5   :  { %v449_v51 = vadd.f32 1.0, %v892_v46  ;;  %905 = vtanh.f32 %v400_v45  ;;  %v411_v52 = vadd.f32 %v831_v49, %v1065_v22  ;;  %v478_v2 = vmul.f32 %v462_v54, %v446_v55 }
 0x1c6   :  { %v894_v53 = vpop.eup %893  ;;  %v402_v56 = vpop.f32.mrf.mxu1  ;;  %v474_v54 = vunpack.c.l.bf16 %v1030_v14  ;;  %v475_v55 = vunpack.c.h.bf16 %v1030_v14 }
 0x1c7   :  { %v481_v57 = vmul.f32 %v465_v44, %v449_v51  ;;  %v447_v58 = vadd.f32 1.0, %v894_v53  ;;  %907 = vtanh.f32 %v411_v52  ;;  %v403_v59 = vadd.f32 %v1065_v22, %v402_v56  ;;  %v578_v14 = vpop.permute.xlu0 %577 }
 0x1c8   :  { %v896_v60 = vpop.eup %895  ;;  %v834_v61 = vpop.f32.mrf.mxu1  ;;  %v477_v51 = vunpack.c.h.bf16 %v1037_v15 }
 0x1c9   :  { %v479_v62 = vmul.f32 %v463_v50, %v447_v58  ;;  %909 = vtanh.f32 %v403_v59  ;;  %v424_v63 = vadd.f32 %v834_v61, %v1065_v22  ;;  %v452_v3 = vadd.f32 1.0, %v896_v60 }
 0x1ca   :  { %v898_v0 = vpop.eup %897  ;;  %v415_v4 = vpop.f32.mrf.mxu1  ;;  %v1085_v5 = vpack.c.bf16 %v481_v57, %v480_v9  ;;  %v476_v50 = vunpack.c.l.bf16 %v1037_v15 }
 0x1cb   :  { %911 = vtanh.f32 %v424_v63  ;;  %v416_v7 = vadd.f32 %v1065_v22, %v415_v4  ;;  %v1095_v19 = vpack.c.bf16 %v479_v62, %v478_v2  ;;  %v450_v20 = vadd.f32 1.0, %v898_v0  ;;  %v574_v0 = vld [vmem:[%s1151_s1] sm:$0xff] }
 0x1cc   :  { %v900_v8 = vpop.eup %899  ;;  %v835_v18 = vpop.f32.mrf.mxu1  ;;  %742 = vst [vmem:[%s1150_s7 + $0x8] sm:$0xff] %v1085_v5   ;;  %v484_v25 = vmul.f32 %v468_v1, %v452_v3  ;;  %vm579_vm2 = vcmp.eq.s32.totalorder %v574_v0, %v578_v14  ;;  %v922_v1 = vmov 1.0|1.0  }
 0x1cd   :  { %v453_v23 = vadd.f32 1.0, %v900_v8  ;;  %913 = vtanh.f32 %v416_v7  ;;  %v427_v11 = vadd.f32 %v835_v18, %v1065_v22  ;;  %706 = vst [vmem:[%s1150_s7] sm:$0xff] %v1095_v19   ;;  %v482_v30 = vmul.f32 %v466_v16, %v450_v20  ;;  %vm684_vm3 = vmpackc.low %vm579_vm2, %vm579_vm2 }
 0x1ce   :  { %v902_v24 = vpop.eup %901  ;;  %v418_v26 = vpop.f32.mrf.mxu1 }
 0x1cf   :  { %v485_v10 = vmul.f32 %v469_v6, %v453_v23  ;;  %v451_v27 = vadd.f32 1.0, %v902_v24  ;;  %915 = vtanh.f32 %v427_v11  ;;  %v419_v28 = vadd.f32 %v1065_v22, %v418_v26 }
 0x1d0   :  { %v904_v29 = vpop.eup %903  ;;  %v471_v22 = vunpack.c.h.bf16 %v1018_v12 }
 0x1d1   :  { %v483_v31 = vmul.f32 %v467_v17, %v451_v27  ;;  %917 = vtanh.f32 %v419_v28  ;;  %v497_v32 = vpack.c.bf16 %v485_v10, %v484_v25  ;;  %v456_v36 = vadd.f32 1.0, %v904_v29 }
 0x1d2   :  { %v906_v33 = vpop.eup %905 }
 0x1d3   :  { %744 = vst [vmem:[%s1150_s7 + $0x18] sm:$0xff] %v497_v32   ;;  %v496_v37 = vpack.c.bf16 %v483_v31, %v482_v30  ;;  %v454_v40 = vadd.f32 1.0, %v906_v33  ;;  %v488_v43 = vmul.f32 %v472_v34, %v456_v36 }
 0x1d4   :  { %v908_v38 = vpop.eup %907 }
 0x1d5   :  { %v457_v41 = vadd.f32 1.0, %v908_v38  ;;  %743 = vst [vmem:[%s1150_s7 + $0x10] sm:$0xff] %v496_v37   ;;  %v486_v46 = vmul.f32 %v470_v39, %v454_v40 }
 0x1d6   :  { %v910_v42 = vpop.eup %909 }
 0x1d7   :  { %v489_v13 = vmul.f32 %v473_v35, %v457_v41  ;;  %v455_v44 = vadd.f32 1.0, %v910_v42 }
 0x1d8   :  { %v912_v45 = vpop.eup %911 }
 0x1d9   :  { %v487_v47 = vmul.f32 %v471_v22, %v455_v44  ;;  %v499_v48 = vpack.c.bf16 %v489_v13, %v488_v43  ;;  %v460_v12 = vadd.f32 1.0, %v912_v45 }
 0x1da   :  { %v914_v49 = vpop.eup %913 }
 0x1db   :  { %746 = vst [vmem:[%s1150_s7 + $0x28] sm:$0xff] %v499_v48   ;;  %v498_v52 = vpack.c.bf16 %v487_v47, %v486_v46  ;;  %v458_v56 = vadd.f32 1.0, %v914_v49  ;;  %v492_v59 = vmul.f32 %v476_v50, %v460_v12 }
 0x1dc   :  { %v916_v53 = vpop.eup %915 }
 0x1dd   :  { %v461_v57 = vadd.f32 1.0, %v916_v53  ;;  %745 = vst [vmem:[%s1150_s7 + $0x20] sm:$0xff] %v498_v52   ;;  %v490_v9 = vmul.f32 %v474_v54, %v458_v56 }
 0x1de   :  { %v918_v58 = vpop.eup %917 }
 0x1df   :  { %v493_v15 = vmul.f32 %v477_v51, %v461_v57  ;;  %v459_v60 = vadd.f32 1.0, %v918_v58 }
 0x1e1   :  { %v491_v61 = vmul.f32 %v475_v55, %v459_v60  ;;  %v501_v62 = vpack.c.bf16 %v493_v15, %v492_v59 }
 0x1e3   :  { %748 = vst [vmem:[%s1150_s7 + $0x38] sm:$0xff] %v501_v62   ;;  %837 = vmatpush3.bf16.msra.mxu1 %v501_v62  ;;  %v500_v63 = vpack.c.bf16 %v491_v61, %v490_v9 }
 0x1e4   :  { %838 = vmatprep.subr.bf16.mxu1 %v920_v21 }
 0x1e5   :  { %747 = vst [vmem:[%s1150_s7 + $0x30] sm:$0xff] %v500_v63  }
 0x1e7   :  { %839 = vmatpush3.bf16.msra.mxu1 %v500_v63 }
 0x1e8   :  { %840 = vmatprep.subr.bf16.mxu1 %v920_v21 }
 0x1eb   :  { %841 = vmatpush3.bf16.msra.mxu1 %v499_v48 }
 0x1ec   :  { %842 = vmatprep.subr.bf16.mxu1 %v920_v21 }
 0x1ef   :  { %843 = vmatpush3.bf16.msra.mxu1 %v498_v52 }
 0x1f0   :  { %844 = vmatprep.subr.bf16.mxu1 %v920_v21 }
 0x1f3   :  { %845 = vmatpush3.bf16.msra.mxu1 %v497_v32 }
 0x1f4   :  { %846 = vmatprep.subr.bf16.mxu1 %v920_v21 }
 0x1f7   :  { %847 = vmatpush3.bf16.msra.mxu1 %v496_v37 }
 0x1f8   :  { %848 = vmatprep.subr.bf16.mxu1 %v920_v21 }
 0x1fb   :  { %849 = vmatpush3.bf16.msra.mxu1 %v1085_v5 }
 0x1fc   :  { %850 = vmatprep.subr.bf16.mxu1 %v920_v21 }
 0x1ff   :  { %851 = vmatpush3.bf16.msra.mxu1 %v1095_v19 }
 0x202   :  { %853 = vmatmul.mubr.msk.bf16.vlgmr.msra.gmra.mxu1 %vm684_vm3, %v922_v1 }
 0x2c2   :  { %v623_v2 = vpop.f32.mrf.mxu1 }
 0x2c3   :  { %630 = vst [vmem:[%s1152_s8] sm:$0xff] %v623_v2 }
 0x2c4   :  { %v854_v3 = vpop.f32.mrf.mxu1 }
 0x2c6   :  { %v626_v4 = vpop.f32.mrf.mxu1 }
 0x2c8   :  { %v855_v6 = vpop.f32.mrf.mxu1 }

// kernel: attention_module_forward.3
= control target key start
LH: loop header
LB: loop body
LE: loop exit
PB: predicated region body
PF: predicated region fallthrough
CT: control target
= control target key end

     0   :  { %vm162_vm0 = vcmask 1043456   ;;  %vm137_vm1 = vcmask 64512   ;;  %v902_v10 = vmov 0.0   ;;  %v903_v52 = vmov 0   ;;  %s1204_s5 = inlined_call_operand.vmem [shape: bf16[8,128], index: 5, kind: input, shape index: {}]   ;;  %s1205_s3 = inlined_call_operand.vmem [shape: s32[128,8], index: 3, kind: input, shape index: {}]   ;;  %s1206_s4 = inlined_call_operand.vmem [shape: s32[1,8], index: 4, kind: input, shape index: {}]   ;;  %s1207_s6 = inlined_call_operand.vmem [shape: bf16[128,128], index: 6, kind: input, shape index: {}]   ;;  %s1208_s2 = inlined_call_operand.vmem [shape: s32[8,1], index: 2, kind: input, shape index: {}]   ;;  %s1209_s0 = inlined_call_operand.vmem [shape: bf16[128,128], index: 0, kind: input, shape index: {}]   ;;  %s1210_s1 = inlined_call_operand.vmem [shape: s32[8,128], index: 1, kind: input, shape index: {}]   ;;  %s1211_s7 = inlined_call_operand.vmem [shape: f32[8,128], index: 7, kind: output, shape index: {}]  }
   0x1   :  { %v136_v0 = vld [vmem:[%s1204_s5] sm:$0xf]  ;;  %v60_v2 = vld [vmem:[%s1205_s3 + $0x8] sm:$0xff]  ;;  %v61_v5 = vld [vmem:[%s1205_s3 + $0x10] sm:$0xff]  ;;  %829 = vset.pattern.permute.xlu0 %v903_v52 }
   0x2   :  { %v59_v1 = vld [vmem:[%s1205_s3] sm:$0xff]  ;;  %824 = vmatprep.subr.msk.bf16.mxu0 %vm162_vm0, %v136_v0  ;;  %v164_v3 = vsel %vm162_vm0, %v136_v0, 0  ;;  %v62_v6 = vld [vmem:[%s1205_s3 + $0x18] sm:$0xff]  ;;  %v64_v8 = vld [vmem:[%s1205_s3 + $0x28] sm:$0xff] }
   0x3   :  { %v958_v4 = vld [vmem:[%s1206_s4] ss:$0 sm:$0xff]  ;;  %755 = vmatpush3.bf16.msra.mxu0 %v164_v3  ;;  %v65_v9 = vld [vmem:[%s1205_s3 + $0x30] sm:$0xff]  ;;  %v66_v15 = vld [vmem:[%s1205_s3 + $0x38] sm:$0xff] }
   0x4   :  { %vm80_vm2 = vcmp.eq.s32.totalorder %v59_v1, %v958_v4  ;;  %vm81_vm3 = vcmp.eq.s32.totalorder %v60_v2, %v958_v4  ;;  %vm82_vm4 = vcmp.eq.s32.totalorder %v61_v5, %v958_v4  ;;  %vm83_vm5 = vcmp.eq.s32.totalorder %v62_v6, %v958_v4  ;;  %v63_v7 = vld [vmem:[%s1205_s3 + $0x20] sm:$0xff]  ;;  %804 = vmatprep.subr.bf16.mxu0 %v902_v10  ;;  %v68_v19 = vld [vmem:[%s1205_s3 + $0x48] sm:$0xff]  ;;  %v830_v23 = vld [vmem:[%s1207_s6 + $0x38] sm:$0xff]  }
   0x5   :  { %v630_v11 = vsel %vm80_vm2, 1.0, %v902_v10  ;;  %v631_v12 = vsel %vm81_vm3, 1.0, %v902_v10  ;;  %v632_v13 = vsel %vm82_vm4, 1.0, %v902_v10  ;;  %v633_v14 = vsel %vm83_vm5, 1.0, %v902_v10  ;;  %v67_v16 = vld [vmem:[%s1205_s3 + $0x40] sm:$0xff]  ;;  %v831_v24 = vld [vmem:[%s1207_s6 + $0x30] sm:$0xff]   ;;  %772 = vmatprep.subr.bf16.mxu1 %v830_v23 }
   0x6   :  { %v128_v17 = vpack.c.bf16 %v631_v12, %v630_v11  ;;  %v129_v18 = vpack.c.bf16 %v633_v14, %v632_v13  ;;  %vm84_vm6 = vcmp.eq.s32.totalorder %v63_v7, %v958_v4  ;;  %vm85_vm7 = vcmp.eq.s32.totalorder %v64_v8, %v958_v4  ;;  %v69_v27 = vld [vmem:[%s1205_s3 + $0x50] sm:$0xff]  ;;  %v70_v30 = vld [vmem:[%s1205_s3 + $0x58] sm:$0xff]  ;;  %v71_v31 = vld [vmem:[%s1205_s3 + $0x60] sm:$0xff]  ;;  %773 = vmatpush3.bf16.msra.mxu1 %v830_v23 }
   0x7   :  { %v634_v20 = vsel %vm84_vm6, 1.0, %v902_v10  ;;  %v635_v21 = vsel %vm85_vm7, 1.0, %v902_v10  ;;  %vm86_vm8 = vcmp.eq.s32.totalorder %v65_v9, %v958_v4  ;;  %vm87_vm9 = vcmp.eq.s32.totalorder %v66_v15, %v958_v4  ;;  %774 = vmatprep.subr.bf16.mxu1 %v831_v24  ;;  %v832_v32 = vld [vmem:[%s1207_s6 + $0x28] sm:$0xff]   ;;  %v833_v36 = vld [vmem:[%s1207_s6 + $0x20] sm:$0xff]   ;;  %v73_v41 = vld [vmem:[%s1205_s3 + $0x70] sm:$0xff] }
   0x8   :  { %756 = vmatprep.mubr.msk.bf16.mxu0 %vm137_vm1, %v128_v17  ;;  %v130_v22 = vpack.c.bf16 %v635_v21, %v634_v20  ;;  %vm88_vm10 = vcmp.eq.s32.totalorder %v67_v16, %v958_v4  ;;  %vm89_vm11 = vcmp.eq.s32.totalorder %v68_v19, %v958_v4  ;;  %v636_v25 = vsel %vm86_vm8, 1.0, %v902_v10  ;;  %v72_v34 = vld [vmem:[%s1205_s3 + $0x68] sm:$0xff]  ;;  %v74_v42 = vld [vmem:[%s1205_s3 + $0x78] sm:$0xff]  ;;  %v835_v49 = vld [vmem:[%s1207_s6 + $0x10] sm:$0xff]  }
   0x9   :  { %757 = vmatmul.mubr.msk.bf16.vlgmr.msra.gmra.mxu0 %vm137_vm1, %v129_v18  ;;  %v637_v26 = vsel %vm87_vm9, 1.0, %v902_v10  ;;  %v638_v28 = vsel %vm88_vm10, 1.0, %v902_v10  ;;  %v639_v29 = vsel %vm89_vm11, 1.0, %v902_v10  ;;  %vm90_vm12 = vcmp.eq.s32.totalorder %v69_v27, %v958_v4  ;;  %v834_v43 = vld [vmem:[%s1207_s6 + $0x18] sm:$0xff]   ;;  %v836_v50 = vld [vmem:[%s1207_s6 + $0x8] sm:$0xff]   ;;  %v837_v51 = vld [vmem:[%s1207_s6] sm:$0xff]  }
   0xa   :  { %760 = vmatprep.mubr.msk.bf16.mxu0 %vm137_vm1, %v130_v22  ;;  %v131_v33 = vpack.c.bf16 %v637_v26, %v636_v25  ;;  %v132_v35 = vpack.c.bf16 %v639_v29, %v638_v28  ;;  %vm91_vm13 = vcmp.eq.s32.totalorder %v70_v30, %v958_v4  ;;  %775 = vmatpush3.bf16.msra.mxu1 %v831_v24  ;;  %v640_v37 = vsel %vm90_vm12, 1.0, %v902_v10  ;;  %v569_v53 = vld [vmem:[%s1208_s2] sm:$0xff]  ;;  %v1078_v56 = vld [vmem:[%s1209_s0 + $0x8] sm:$0xff]   ;;  %v1095_v5 = vld [vmem:[%s1209_s0 + $0x10] sm:$0xff]  }
   0xb   :  { %vm92_vm14 = vcmp.eq.s32.totalorder %v71_v31, %v958_v4  ;;  %vm93_vm15 = vcmp.eq.s32.totalorder %v72_v34, %v958_v4  ;;  %776 = vmatprep.subr.bf16.mxu1 %v832_v32  ;;  %v641_v38 = vsel %vm91_vm13, 1.0, %v902_v10  ;;  %vm94_vm0 = vcmp.eq.s32.totalorder %v73_v41, %v958_v4  ;;  %571 = vperm.xlu0 %829, %v569_v53   ;;  %v1073_v55 = vld [vmem:[%s1209_s0] sm:$0xff]   ;;  %v1100_v6 = vld [vmem:[%s1209_s0 + $0x18] sm:$0xff]   ;;  %v1122_v24 = vld [vmem:[%s1209_s0 + $0x28] sm:$0xff]  }
   0xc   :  { %v642_v39 = vsel %vm92_vm14, 1.0, %v902_v10  ;;  %v643_v40 = vsel %vm93_vm15, 1.0, %v902_v10  ;;  %v133_v44 = vpack.c.bf16 %v641_v38, %v640_v37  ;;  %vm95_vm2 = vcmp.eq.s32.totalorder %v74_v42, %v958_v4  ;;  %v1117_v22 = vld [vmem:[%s1209_s0 + $0x20] sm:$0xff]   ;;  %v1139_v38 = vld [vmem:[%s1209_s0 + $0x30] sm:$0xff]  }
   0xd   :  { %v134_v45 = vpack.c.bf16 %v643_v40, %v642_v39  ;;  %v644_v46 = vsel %vm94_vm0, 1.0, %v902_v10  ;;  %v645_v47 = vsel %vm95_vm2, 1.0, %v902_v10  ;;  %v688_v58 = vunpack.c.h.bf16 %v1078_v56  ;;  %v1144_v40 = vld [vmem:[%s1209_s0 + $0x38] sm:$0xff]  }
   0xe   :  { %777 = vmatpush3.bf16.msra.mxu1 %v832_v32  ;;  %v135_v48 = vpack.c.bf16 %v645_v47, %v644_v46  ;;  %v683_v59 = vunpack.c.l.bf16 %v1073_v55  ;;  %v684_v60 = vunpack.c.h.bf16 %v1073_v55  ;;  %v687_v61 = vunpack.c.l.bf16 %v1078_v56 }
   0xf   :  { %778 = vmatprep.subr.bf16.mxu1 %v833_v36  ;;  %v696_v11 = vunpack.c.h.bf16 %v1100_v6  ;;  %v691_v12 = vunpack.c.l.bf16 %v1095_v5  ;;  %v692_v13 = vunpack.c.h.bf16 %v1095_v5  ;;  %v695_v14 = vunpack.c.l.bf16 %v1100_v6  ;;  %v568_v5 = vld [vmem:[%s1210_s1] sm:$0xff] }
  0x10   :  { %v704_v27 = vunpack.c.h.bf16 %v1122_v24  ;;  %v699_v28 = vunpack.c.l.bf16 %v1117_v22  ;;  %v700_v29 = vunpack.c.h.bf16 %v1117_v22  ;;  %v703_v30 = vunpack.c.l.bf16 %v1122_v24 }
  0x11   :  { %761 = vmatmul.mubr.msk.bf16.gmra.mxu0 %vm137_vm1, %v131_v33  ;;  %v711_v46 = vunpack.c.l.bf16 %v1144_v40 }
  0x12   :  { %764 = vmatprep.mubr.msk.bf16.mxu0 %vm137_vm1, %v132_v35  ;;  %779 = vmatpush3.bf16.msra.mxu1 %v833_v36 }
  0x13   :  { %780 = vmatprep.subr.bf16.mxu1 %v834_v43 }
  0x16   :  { %781 = vmatpush3.bf16.msra.mxu1 %v834_v43  ;;  %v712_v43 = vunpack.c.h.bf16 %v1144_v40 }
  0x17   :  { %782 = vmatprep.subr.bf16.mxu1 %v835_v49 }
  0x19   :  { %765 = vmatmul.mubr.msk.bf16.gmra.mxu0 %vm137_vm1, %v133_v44  ;;  %v707_v44 = vunpack.c.l.bf16 %v1139_v38 }
  0x1a   :  { %768 = vmatprep.mubr.msk.bf16.mxu0 %vm137_vm1, %v134_v45  ;;  %783 = vmatpush3.bf16.msra.mxu1 %v835_v49  ;;  %v708_v45 = vunpack.c.h.bf16 %v1139_v38 }
  0x1b   :  { %784 = vmatprep.subr.bf16.mxu1 %v836_v50 }
  0x1e   :  { %785 = vmatpush3.bf16.msra.mxu1 %v836_v50 }
  0x1f   :  { %786 = vmatprep.subr.bf16.mxu1 %v837_v51 }
  0x21   :  { %769 = vmatmul.mubr.msk.bf16.gmra.mxu0 %vm137_vm1, %v135_v48  ;;  %vm904_vm1 = vmmov 0  }
  0x22   :  { %787 = vmatpush3.bf16.msra.mxu1 %v837_v51  ;;  %820 = vmatprep.mubr.msk.bf16.mxu0 %vm904_vm1, %v902_v10 }
  0xc9   :  { %v758_v54 = vpop.f32.mrf.mxu0 }
  0xca   :  { %v265_v3 = vmul.f32 %v758_v54, %v687_v61 }
  0xcb   :  { %v200_v57 = vpop.f32.mrf.mxu0 }
  0xcc   :  { %v263_v1 = vmul.f32 %v683_v59, %v200_v57 }
  0xcd   :  { %v759_v62 = vpop.f32.mrf.mxu0 }
  0xce   :  { %v266_v63 = vmul.f32 %v759_v62, %v688_v58 }
  0xcf   :  { %v203_v0 = vpop.f32.mrf.mxu0 }
  0xd0   :  { %v264_v2 = vmul.f32 %v684_v60, %v203_v0  ;;  %v280_v8 = vpack.c.bf16 %v266_v63, %v265_v3 }
  0xd1   :  { %v762_v4 = vpop.f32.mrf.mxu0 }
  0xd2   :  { %v279_v7 = vpack.c.bf16 %v264_v2, %v263_v1  ;;  %v269_v20 = vmul.f32 %v762_v4, %v695_v14 }
  0xd3   :  { %v216_v9 = vpop.f32.mrf.mxu0 }
  0xd4   :  { %788 = vmatprep.mubr.bf16.mxu1 %v279_v7  ;;  %v267_v18 = vmul.f32 %v691_v12, %v216_v9 }
  0xd5   :  { %v763_v15 = vpop.f32.mrf.mxu0  ;;  %789 = vmatmul.mubr.bf16.vlgmr.msra.gmra.mxu1 %v280_v8 }
  0xd6   :  { %v270_v16 = vmul.f32 %v763_v15, %v696_v11 }
  0xd7   :  { %v219_v17 = vpop.f32.mrf.mxu0 }
  0xd8   :  { %v268_v19 = vmul.f32 %v692_v13, %v219_v17  ;;  %v282_v25 = vpack.c.bf16 %v270_v16, %v269_v20 }
  0xd9   :  { %v766_v21 = vpop.f32.mrf.mxu0 }
  0xda   :  { %v281_v23 = vpack.c.bf16 %v268_v19, %v267_v18  ;;  %v273_v36 = vmul.f32 %v766_v21, %v703_v30 }
  0xdb   :  { %v232_v26 = vpop.f32.mrf.mxu0 }
  0xdc   :  { %792 = vmatprep.mubr.bf16.mxu1 %v281_v23  ;;  %v271_v34 = vmul.f32 %v699_v28, %v232_v26 }
  0xdd   :  { %v767_v31 = vpop.f32.mrf.mxu0  ;;  %793 = vmatmul.mubr.bf16.gmra.mxu1 %v282_v25 }
  0xde   :  { %v274_v32 = vmul.f32 %v767_v31, %v704_v27 }
  0xdf   :  { %v235_v33 = vpop.f32.mrf.mxu0 }
  0xe0   :  { %v272_v35 = vmul.f32 %v700_v29, %v235_v33  ;;  %v284_v41 = vpack.c.bf16 %v274_v32, %v273_v36 }
  0xe1   :  { %v770_v37 = vpop.f32.mrf.mxu0 }
  0xe2   :  { %v283_v39 = vpack.c.bf16 %v272_v35, %v271_v34  ;;  %v277_v52 = vmul.f32 %v770_v37, %v711_v46 }
  0xe3   :  { %v248_v42 = vpop.f32.mrf.mxu0 }
  0xe4   :  { %796 = vmatprep.mubr.bf16.mxu1 %v283_v39  ;;  %v275_v50 = vmul.f32 %v707_v44, %v248_v42 }
  0xe5   :  { %v771_v47 = vpop.f32.mrf.mxu0  ;;  %797 = vmatmul.mubr.bf16.gmra.mxu1 %v284_v41 }
  0xe6   :  { %v278_v48 = vmul.f32 %v771_v47, %v712_v43 }
  0xe7   :  { %v251_v49 = vpop.f32.mrf.mxu0 }
  0xe8   :  { %v276_v51 = vmul.f32 %v708_v45, %v251_v49  ;;  %v286_v54 = vpack.c.bf16 %v278_v48, %v277_v52 }
  0xea   :  { %v285_v53 = vpack.c.bf16 %v276_v51, %v275_v50 }
  0xec   :  { %800 = vmatprep.mubr.bf16.mxu1 %v285_v53 }
  0xed   :  { %801 = vmatmul.mubr.bf16.gmra.mxu1 %v286_v54 }
 0x195   :  { %v790_v57 = vpop.f32.mrf.mxu1 }
 0x196   :  { %v664_v36 = vmul.f32 -1.442695, %v790_v57 }
 0x197   :  { %v385_v62 = vpop.f32.mrf.mxu1 }
 0x199   :  { %v791_v63 = vpop.f32.mrf.mxu1 }
 0x19a   :  { %v665_v48 = vmul.f32 -1.442695, %v791_v63 }
 0x19b   :  { %v388_v0 = vpop.f32.mrf.mxu1 }
 0x19c   :  { %v663_v57 = vmul.f32 -1.442695, %v388_v0 }
 0x19d   :  { %v794_v1 = vpop.f32.mrf.mxu1 }
 0x19e   :  { %v668_v35 = vmul.f32 -1.442695, %v794_v1 }
 0x19f   :  { %v401_v2 = vpop.f32.mrf.mxu1 }
 0x1a0   :  { %v666_v41 = vmul.f32 -1.442695, %v401_v2 }
 0x1a1   :  { %v795_v3 = vpop.f32.mrf.mxu1 }
 0x1a2   :  { %v669_v34 = vmul.f32 -1.442695, %v795_v3 }
 0x1a3   :  { %v404_v4 = vpop.f32.mrf.mxu1 }
 0x1a4   :  { %v667_v37 = vmul.f32 -1.442695, %v404_v4  ;;  %v662_v4 = vmul.f32 -1.442695, %v385_v62 }
 0x1a5   :  { %v798_v7 = vpop.f32.mrf.mxu1 }
 0x1a6   :  { %v672_v23 = vmul.f32 -1.442695, %v798_v7 }
 0x1a7   :  { %v417_v8 = vpop.f32.mrf.mxu1 }
 0x1a8   :  { %v670_v33 = vmul.f32 -1.442695, %v417_v8 }
 0x1a9   :  { %v799_v9 = vpop.f32.mrf.mxu1 }
 0x1aa   :  { %v673_v19 = vmul.f32 -1.442695, %v799_v9 }
 0x1ab   :  { %v420_v15 = vpop.f32.mrf.mxu1 }
 0x1ac   :  { %v671_v32 = vmul.f32 -1.442695, %v420_v15 }
 0x1ad   :  { %v802_v16 = vpop.f32.mrf.mxu1 }
 0x1ae   :  { %v676_v17 = vmul.f32 -1.442695, %v802_v16 }
 0x1af   :  { %v433_v18 = vpop.f32.mrf.mxu1 }
 0x1b0   :  { %v674_v20 = vmul.f32 -1.442695, %v433_v18  ;;  %838 = vpow2.f32 %v676_v17 }
 0x1b1   :  { %v803_v21 = vpop.f32.mrf.mxu1 }
 0x1b2   :  { %v677_v25 = vmul.f32 -1.442695, %v803_v21  ;;  %840 = vpow2.f32 %v674_v20 }
 0x1b3   :  { %v436_v26 = vpop.f32.mrf.mxu1  ;;  %842 = vpow2.f32 %v673_v19 }
 0x1b4   :  { %v675_v31 = vmul.f32 -1.442695, %v436_v26  ;;  %844 = vpow2.f32 %v677_v25 }
 0x1b5   :  { %846 = vpow2.f32 %v672_v23 }
 0x1b6   :  { %848 = vpow2.f32 %v675_v31 }
 0x1b7   :  { %850 = vpow2.f32 %v671_v32 }
 0x1b8   :  { %852 = vpow2.f32 %v670_v33 }
 0x1b9   :  { %854 = vpow2.f32 %v669_v34 }
 0x1ba   :  { %856 = vpow2.f32 %v668_v35 }
 0x1bb   :  { %858 = vpow2.f32 %v664_v36 }
 0x1bc   :  { %860 = vpow2.f32 %v667_v37 }
 0x1bd   :  { %v839_v39 = vpop.eup %838  ;;  %862 = vpow2.f32 %v666_v41 }
 0x1be   :  { %v510_v42 = vadd.f32 1.0, %v839_v39 }
 0x1bf   :  { %v841_v47 = vpop.eup %840 }
 0x1c0   :  { %v843_v49 = vpop.eup %842  ;;  %v508_v51 = vadd.f32 1.0, %v841_v47  ;;  %864 = vrcp.f32 %v510_v42 }
 0x1c1   :  { %v845_v50 = vpop.eup %844  ;;  %866 = vpow2.f32 %v665_v48  ;;  %v507_v1 = vadd.f32 1.0, %v843_v49 }
 0x1c2   :  { %v847_v52 = vpop.eup %846  ;;  %v511_v53 = vadd.f32 1.0, %v845_v50 }
 0x1c3   :  { %v849_v54 = vpop.eup %848  ;;  %v506_v7 = vadd.f32 1.0, %v847_v52 }
 0x1c4   :  { %868 = vrcp.f32 %v511_v53  ;;  %v509_v3 = vadd.f32 1.0, %v849_v54  ;;  %v851_v2 = vpop.eup %850 }
 0x1c5   :  { %870 = vrcp.f32 %v508_v51  ;;  %v853_v63 = vpop.eup %852  ;;  %v505_v8 = vadd.f32 1.0, %v851_v2 }
 0x1c6   :  { %872 = vrcp.f32 %v509_v3  ;;  %v855_v9 = vpop.eup %854  ;;  %v504_v15 = vadd.f32 1.0, %v853_v63 }
 0x1c7   :  { %874 = vpow2.f32 %v663_v57  ;;  %v857_v16 = vpop.eup %856  ;;  %v503_v18 = vadd.f32 1.0, %v855_v9 }
 0x1c8   :  { %876 = vrcp.f32 %v507_v1  ;;  %v859_v17 = vpop.eup %858  ;;  %v502_v20 = vadd.f32 1.0, %v857_v16 }
 0x1c9   :  { %878 = vpow2.f32 %v662_v4  ;;  %v861_v0 = vpop.eup %860  ;;  %v498_v47 = vadd.f32 1.0, %v859_v17 }
 0x1ca   :  { %880 = vrcp.f32 %v506_v7  ;;  %v863_v19 = vpop.eup %862  ;;  %v501_v23 = vadd.f32 1.0, %v861_v0 }
 0x1cb   :  { %882 = vrcp.f32 %v505_v8  ;;  %v500_v31 = vadd.f32 1.0, %v863_v19  ;;  %v572_v8 = vpop.permute.xlu0 %571 }
 0x1cc   :  { %884 = vrcp.f32 %v504_v15  ;;  %vm573_vm3 = vcmp.eq.s32.totalorder %v568_v5, %v572_v8 }
 0x1cd   :  { %v865_v62 = vpop.eup %864  ;;  %886 = vrcp.f32 %v503_v18  ;;  %vm679_vm4 = vmpackc.low %vm573_vm3, %vm573_vm3 }
 0x1ce   :  { %v867_v21 = vpop.eup %866  ;;  %888 = vrcp.f32 %v502_v20  ;;  %v558_v32 = vmul.f32 %v865_v62, %v711_v46 }
 0x1cf   :  { %v499_v36 = vadd.f32 1.0, %v867_v21  ;;  %890 = vrcp.f32 %v501_v23 }
 0x1d0   :  { %892 = vrcp.f32 %v500_v31 }
 0x1d1   :  { %v869_v25 = vpop.eup %868  ;;  %894 = vrcp.f32 %v499_v36 }
 0x1d2   :  { %v871_v26 = vpop.eup %870  ;;  %v559_v33 = vmul.f32 %v869_v25, %v712_v43  ;;  %896 = vrcp.f32 %v498_v47 }
 0x1d3   :  { %v873_v34 = vpop.eup %872  ;;  %v556_v48 = vmul.f32 %v871_v26, %v707_v44 }
 0x1d4   :  { %v875_v35 = vpop.eup %874  ;;  %v567_v37 = vpack.c.bf16 %v559_v33, %v558_v32  ;;  %v557_v39 = vmul.f32 %v873_v34, %v708_v45 }
 0x1d5   :  { %v877_v41 = vpop.eup %876  ;;  %v497_v40 = vadd.f32 1.0, %v875_v35 }
 0x1d6   :  { %v879_v42 = vpop.eup %878  ;;  %805 = vmatpush3.bf16.msra.mxu0 %v567_v37  ;;  %v566_v43 = vpack.c.bf16 %v557_v39, %v556_v48  ;;  %v555_v49 = vmul.f32 %v877_v41, %v704_v27 }
 0x1d7   :  { %v881_v46 = vpop.eup %880  ;;  %806 = vmatprep.subr.bf16.mxu0 %v902_v10  ;;  %v496_v45 = vadd.f32 1.0, %v879_v42  ;;  %898 = vrcp.f32 %v497_v40 }
 0x1d8   :  { %v883_v50 = vpop.eup %882  ;;  %v554_v51 = vmul.f32 %v881_v46, %v703_v30 }
 0x1d9   :  { %v885_v52 = vpop.eup %884  ;;  %v553_v44 = vmul.f32 %v883_v50, %v700_v29  ;;  %900 = vrcp.f32 %v496_v45 }
 0x1da   :  { %807 = vmatpush3.bf16.msra.mxu0 %v566_v43  ;;  %v565_v38 = vpack.c.bf16 %v555_v49, %v554_v51  ;;  %v887_v53 = vpop.eup %886  ;;  %v552_v27 = vmul.f32 %v885_v52, %v699_v28 }
 0x1db   :  { %808 = vmatprep.subr.bf16.mxu0 %v902_v10  ;;  %v889_v54 = vpop.eup %888  ;;  %v551_v24 = vmul.f32 %v887_v53, %v696_v11 }
 0x1dc   :  { %v564_v57 = vpack.c.bf16 %v553_v44, %v552_v27  ;;  %v891_v30 = vpop.eup %890  ;;  %v550_v1 = vmul.f32 %v889_v54, %v695_v14 }
 0x1dd   :  { %v893_v3 = vpop.eup %892  ;;  %v549_v22 = vmul.f32 %v891_v30, %v692_v13 }
 0x1de   :  { %809 = vmatpush3.bf16.msra.mxu0 %v565_v38  ;;  %v563_v29 = vpack.c.bf16 %v551_v24, %v550_v1  ;;  %v895_v28 = vpop.eup %894  ;;  %v548_v2 = vmul.f32 %v893_v3, %v691_v12 }
 0x1df   :  { %810 = vmatprep.subr.bf16.mxu0 %v902_v10  ;;  %v897_v4 = vpop.eup %896  ;;  %v547_v6 = vmul.f32 %v895_v28, %v688_v58 }
 0x1e0   :  { %v562_v11 = vpack.c.bf16 %v549_v22, %v548_v2  ;;  %v546_v7 = vmul.f32 %v897_v4, %v687_v61  ;;  %v905_v61 = vmov 1.0|1.0  }
 0x1e2   :  { %811 = vmatpush3.bf16.msra.mxu0 %v564_v57  ;;  %v561_v13 = vpack.c.bf16 %v547_v6, %v546_v7 }
 0x1e3   :  { %812 = vmatprep.subr.bf16.mxu0 %v902_v10 }
 0x1e4   :  { %v899_v14 = vpop.eup %898 }
 0x1e5   :  { %v545_v12 = vmul.f32 %v899_v14, %v684_v60 }
 0x1e6   :  { %813 = vmatpush3.bf16.msra.mxu0 %v563_v29  ;;  %v901_v63 = vpop.eup %900 }
 0x1e7   :  { %814 = vmatprep.subr.bf16.mxu0 %v902_v10  ;;  %v544_v58 = vmul.f32 %v901_v63, %v683_v59 }
 0x1e9   :  { %v560_v56 = vpack.c.bf16 %v545_v12, %v544_v58 }
 0x1ea   :  { %815 = vmatpush3.bf16.msra.mxu0 %v562_v11 }
 0x1eb   :  { %816 = vmatprep.subr.bf16.mxu0 %v902_v10 }
 0x1ee   :  { %817 = vmatpush3.bf16.msra.mxu0 %v561_v13 }
 0x1ef   :  { %818 = vmatprep.subr.bf16.mxu0 %v902_v10 }
 0x1f2   :  { %819 = vmatpush3.bf16.msra.mxu0 %v560_v56 }
 0x1f5   :  { %821 = vmatmul.mubr.msk.bf16.vlgmr.msra.gmra.mxu0 %vm679_vm4, %v905_v61 }
 0x2b5   :  { %v617_v9 = vpop.f32.mrf.mxu0 }
 0x2b6   :  { %624 = vst [vmem:[%s1211_s7] sm:$0xff] %v617_v9 }
 0x2b7   :  { %v822_v15 = vpop.f32.mrf.mxu0 }
 0x2b9   :  { %v620_v16 = vpop.f32.mrf.mxu0 }
 0x2bb   :  { %v823_v60 = vpop.f32.mrf.mxu0 }

</bundles_post_ra>
